<compile_context>
chip_gen: v5e
topology: v5e:2x2
jax: 0.10.0
libtpu: 0.0.40
codegen_flags: <defaults>
</compile_context>

<pallas_src>
import functools

import jax
import jax.numpy as jnp
from jax.experimental import pallas as pl
from jax.experimental.pallas import tpu as pltpu

_MIB = 1024 * 1024


def _vmem_capacity_bytes():
    """Per-core VMEM capacity; conservative (v7x) default if unqueryable."""
    try:
        info = pltpu.get_tpu_info()
        cap = getattr(info, "vmem_capacity_bytes", None)
        if cap:
            return int(cap)
    except Exception:
        pass
    return 64 * _MIB


def _sublane_align(dtype):
    """Dtype-aware sublane alignment for the C tile (8 f32 / 16 bf16 / 32 i8)."""
    return max(8, 32 // jnp.dtype(dtype).itemsize)


def _pick_tile(total, align, target):
    """Largest multiple of `align` that divides `total` and is <= `target`.

    Falls back to the full dim (block dim == full array dim is always legal),
    so non-aligned shapes (e.g. HW = 7*7) still compile correctly.
    """
    if total <= target or total % align != 0:
        return total
    t = (target // align) * align
    while t >= align:
        if total % t == 0:
            return t
        t -= align
    return total


# ---------------- Fused single-pass kernel: pool + excite + rescale ---------

def _fused_kernel(x_ref, w1_ref, b1_ref, w2_ref, b2_ref, o_ref, *, inv_hw):
    x = x_ref[...]                                                  # (1, C, HW)
    # f32-accumulated global average pool (one bounded slab widened at a time).
    pooled = jnp.sum(x.astype(jnp.float32), axis=-1) * inv_hw       # (1, C)
    h = jnp.dot(pooled, w1_ref[...].astype(jnp.float32),
                preferred_element_type=jnp.float32)
    h = jnp.maximum(h + b1_ref[...].astype(jnp.float32), 0.0)       # (1, Cr)
    s = jnp.dot(h, w2_ref[...].astype(jnp.float32),
                preferred_element_type=jnp.float32)
    s = jax.nn.sigmoid(s + b2_ref[...].astype(jnp.float32))         # (1, C)
    # Native-dtype broadcast multiply; the slab is still resident in VMEM.
    o_ref[...] = x * s[:, :, None].astype(x.dtype)


# ---------------- Phase 1 (fallback): global average pool (f32 sums) --------

def _pool_kernel_simple(x_ref, psum_ref):
    k = pl.program_id(2)

    @pl.when(k == 0)
    def _():
        psum_ref[...] = jnp.zeros_like(psum_ref)

    psum_ref[...] += jnp.sum(x_ref[...].astype(jnp.float32),
                             axis=-1, keepdims=True)


def _pool_kernel_lanedense(x_ref, psum_ref, acc_ref, *, lane_chunks):
    # Accumulate into a lane-dense (1, TC, 128) f32 scratch with VPU adds over
    # static 128-lane slices (no relayout); do the single cross-lane (XLU)
    # reduce only on the last reduction step.
    k = pl.program_id(2)

    @pl.when(k == 0)
    def _():
        acc_ref[...] = jnp.zeros_like(acc_ref)

    xw = x_ref[...].astype(jnp.float32)                             # (1, TC, THW)
    lane_sum = xw[:, :, 0:128]
    for j in range(1, lane_chunks):                                 # static unroll
        lane_sum = lane_sum + xw[:, :, j * 128:(j + 1) * 128]
    acc_ref[...] += lane_sum

    @pl.when(k == pl.num_programs(2) - 1)
    def _():
        psum_ref[...] = jnp.sum(acc_ref[...], axis=-1, keepdims=True)


# ---------------- Phase 2 (fallback): excitation, batched over all N --------

def _excite_kernel(psum_ref, w1_ref, b1_ref, w2_ref, b2_ref, s_ref, *, inv_hw):
    pooled = psum_ref[...][:, :, 0] * inv_hw                        # (N, C) f32
    h = jnp.dot(pooled, w1_ref[...].astype(jnp.float32),
                preferred_element_type=jnp.float32)
    h = jnp.maximum(h + b1_ref[...].astype(jnp.float32), 0.0)       # (N, Cr)
    s = jnp.dot(h, w2_ref[...].astype(jnp.float32),
                preferred_element_type=jnp.float32)
    s = jax.nn.sigmoid(s + b2_ref[...].astype(jnp.float32))         # (N, C)
    s_ref[...] = s[:, :, None].astype(s_ref.dtype)                  # (N, C, 1)


# ---------------- Phase 3 (fallback): broadcast rescale (lane-dense) --------

def _rescale_kernel(x_ref, s_ref, o_ref):
    # Native-dtype multiply; the (1, TC, 1) scale block broadcasts over lanes.
    o_ref[...] = x_ref[...] * s_ref[...]


# ---------------- Wrapper ----------------------------------------------------

def se_block(x_nchw, w1, b1, w2, b2, *, tile_c=256, tile_hw=2048, path="auto"):
    """SEBlock forward.

    x_nchw : (N, C, H, W)
    w1     : (C, Cr)   == torch Linear(C, Cr).weight.T
    b1     : (1, Cr)
    w2     : (Cr, C)   == torch Linear(Cr, C).weight.T
    b2     : (1, C)
    path   : "auto" (size-gated), "fused", or "tiled"
    """
    N, C, H, W = x_nchw.shape
    HW = H * W
    x = x_nchw.reshape(N, C, HW)                 # free reshape, no transpose
    itemsize = jnp.dtype(x.dtype).itemsize
    inv_hw = 1.0 / HW

    vmem_cap = _vmem_capacity_bytes()
    # Leave headroom against physical VMEM (64 MiB/TC on v7x, 128 on v5e/v6e);
    # also overrides v5e's tiny 16 MiB default scoped limit.
    vmem_limit = min((vmem_cap * 3) // 4, 96 * _MIB)

    weight_bytes = sum(int(a.size) * jnp.dtype(a.dtype).itemsize
                       for a in (w1, b1, w2, b2))
    slab_bytes = C * HW * itemsize
    # Fused path holds double-buffered input + output slabs plus weights.
    fused_bytes = 4 * slab_bytes + 2 * weight_bytes + 2 * _MIB
    if path == "fused":
        use_fused = True
    elif path == "tiled":
        use_fused = False
    else:
        use_fused = fused_bytes <= int(vmem_cap * 0.4)

    if use_fused:
        out = pl.pallas_call(
            functools.partial(_fused_kernel, inv_hw=inv_hw),
            out_shape=jax.ShapeDtypeStruct((N, C, HW), x.dtype),
            grid_spec=pltpu.PrefetchScalarGridSpec(
                num_scalar_prefetch=0,
                grid=(N,),
                in_specs=[
                    pl.BlockSpec((1, C, HW), lambda n: (n, 0, 0)),
                    pl.BlockSpec(w1.shape, lambda n: (0, 0)),
                    pl.BlockSpec(b1.shape, lambda n: (0, 0)),
                    pl.BlockSpec(w2.shape, lambda n: (0, 0)),
                    pl.BlockSpec(b2.shape, lambda n: (0, 0)),
                ],
                out_specs=pl.BlockSpec((1, C, HW), lambda n: (n, 0, 0)),
            ),
            compiler_params=pltpu.CompilerParams(
                dimension_semantics=("parallel",),
                vmem_limit_bytes=vmem_limit),
        )(x, w1, b1, w2, b2)
        return out.reshape(N, C, H, W)

    # ---------------- Tiled 3-phase fallback (very large C*HW slabs) --------
    c_align = _sublane_align(x.dtype)
    tc = _pick_tile(C, c_align, tile_c)
    thw = _pick_tile(HW, 128, tile_hw)
    # Note: when HW is not a multiple of 128 (e.g. 7x7 maps) the last store
    # tile is partially masked; such shapes normally take the fused path.

    lane_dense_pool = (thw % 128 == 0) and (thw >= 256)
    if lane_dense_pool:
        pool_kernel = functools.partial(_pool_kernel_lanedense,
                                        lane_chunks=thw // 128)
        pool_scratch = [pltpu.VMEM((1, tc, 128), jnp.float32)]
    else:
        pool_kernel = _pool_kernel_simple
        pool_scratch = []

    # --- Phase 1: per-(batch, channel) spatial sums (f32) ---
    psum = pl.pallas_call(
        pool_kernel,
        out_shape=jax.ShapeDtypeStruct((N, C, 1), jnp.float32),
        grid_spec=pltpu.PrefetchScalarGridSpec(
            num_scalar_prefetch=0,
            grid=(N, C // tc, HW // thw),
            in_specs=[pl.BlockSpec((1, tc, thw), lambda n, c, k: (n, c, k))],
            out_specs=pl.BlockSpec((1, tc, 1), lambda n, c, k: (n, c, 0)),
            scratch_shapes=pool_scratch,
        ),
        compiler_params=pltpu.CompilerParams(
            dimension_semantics=("parallel", "parallel", "arbitrary"),
            vmem_limit_bytes=vmem_limit),
    )(x)

    # --- Phase 2: excitation, batched over all N in one small kernel ---
    s = pl.pallas_call(
        functools.partial(_excite_kernel, inv_hw=inv_hw),
        out_shape=jax.ShapeDtypeStruct((N, C, 1), x.dtype),
        compiler_params=pltpu.CompilerParams(vmem_limit_bytes=vmem_limit),
    )(psum, w1, b1, w2, b2)

    # --- Phase 3: tiled, lane-dense rescale (all grid axes parallel) ---
    out = pl.pallas_call(
        _rescale_kernel,
        out_shape=jax.ShapeDtypeStruct((N, C, HW), x.dtype),
        grid_spec=pltpu.PrefetchScalarGridSpec(
            num_scalar_prefetch=0,
            grid=(N, C // tc, HW // thw),
            in_specs=[
                pl.BlockSpec((1, tc, thw), lambda n, c, k: (n, c, k)),
                pl.BlockSpec((1, tc, 1), lambda n, c, k: (n, c, 0)),
            ],
            out_specs=pl.BlockSpec((1, tc, thw), lambda n, c, k: (n, c, k)),
        ),
        compiler_params=pltpu.CompilerParams(
            dimension_semantics=("parallel", "parallel", "parallel"),
            vmem_limit_bytes=vmem_limit),
    )(x, s)

    return out.reshape(N, C, H, W)


def se_block_ref(x_nchw, w1, b1, w2, b2):
    """Pure-JAX reference matching the PyTorch module semantics."""
    N, C, H, W = x_nchw.shape
    pooled = x_nchw.reshape(N, C, -1).mean(-1)                  # (N, C)
    h = jnp.maximum(pooled @ w1 + b1, 0.0)                      # (N, Cr)
    s = jax.nn.sigmoid(h @ w2 + b2)                             # (N, C)
    return x_nchw * s[:, :, None, None]


if __name__ == "__main__":
    N, C, H, W = 2, 4, 16, 16
    r = 2
    Cr = C // r

    key = jax.random.PRNGKey(0)
    kx, kw1, kb1, kw2, kb2 = jax.random.split(key, 5)

    x = jax.random.normal(kx, (N, C, H, W), dtype=jnp.float32)

    # Deterministic parameter init (nn.Linear shapes; weights stored
    # transposed so the kernel computes y = x @ W.T as pooled @ w1).
    bound1 = 1.0 / (C ** 0.5)
    w1 = jax.random.uniform(kw1, (C, Cr), minval=-bound1, maxval=bound1,
                            dtype=jnp.float32)
    b1 = jax.random.uniform(kb1, (1, Cr), minval=-bound1, maxval=bound1,
                            dtype=jnp.float32)
    bound2 = 1.0 / (Cr ** 0.5)
    w2 = jax.random.uniform(kw2, (Cr, C), minval=-bound2, maxval=bound2,
                            dtype=jnp.float32)
    b2 = jax.random.uniform(kb2, (1, C), minval=-bound2, maxval=bound2,
                            dtype=jnp.float32)

    ref = se_block_ref(x, w1, b1, w2, b2)

    # Fused single-pass path (the auto gate picks it at this size).
    out_fused = jax.block_until_ready(se_block(x, w1, b1, w2, b2))
    assert out_fused.shape == (N, C, H, W)
    assert jnp.allclose(out_fused, ref, atol=1e-5, rtol=1e-5), \
        "fused path mismatch vs reference"

    # Also exercise the tiled 3-phase fallback (used for very large slabs).
    out_tiled = jax.block_until_ready(se_block(x, w1, b1, w2, b2, path="tiled"))
    assert jnp.allclose(out_tiled, ref, atol=1e-5, rtol=1e-5), \
        "tiled path mismatch vs reference"

    print("KERNEL_OK")
</pallas_src>

<mosaic_0001>
module attributes {stable_mosaic.version = 11 : i64} {
  func.func @_fused_kernel(%arg0: i32, %arg1: memref<1x4x256xf32, #tpu.memory_space<vmem>>, %arg2: memref<4x2xf32, #tpu.memory_space<vmem>>, %arg3: memref<1x2xf32, #tpu.memory_space<vmem>>, %arg4: memref<2x4xf32, #tpu.memory_space<vmem>>, %arg5: memref<1x4xf32, #tpu.memory_space<vmem>>, %arg6: memref<1x4x256xf32, #tpu.memory_space<vmem>>) attributes {dimension_semantics = [#tpu.dimension_semantics<parallel>], iteration_bounds = array<i64: 2>, scalar_prefetch = 0 : i64, scratch_operands = 0 : i64, tpu.core_type = #tpu.core_type<tc>, window_params = [{transform_indices = @transform_0, window_bounds = array<i64: 1, 4, 256>}, {pipeline_mode = #tpu.pipeline_mode<synchronous>, transform_indices = @transform_1, window_bounds = array<i64: 4, 2>}, {pipeline_mode = #tpu.pipeline_mode<synchronous>, transform_indices = @transform_2, window_bounds = array<i64: 1, 2>}, {pipeline_mode = #tpu.pipeline_mode<synchronous>, transform_indices = @transform_3, window_bounds = array<i64: 2, 4>}, {pipeline_mode = #tpu.pipeline_mode<synchronous>, transform_indices = @transform_4, window_bounds = array<i64: 1, 4>}, {transform_indices = @transform_5, window_bounds = array<i64: 1, 4, 256>}]} {
    %c0 = arith.constant 0 : index
    %c0_0 = arith.constant 0 : index
    %c0_1 = arith.constant 0 : index
    %0 = vector.load %arg1[%c0, %c0_0, %c0_1] : memref<1x4x256xf32, #tpu.memory_space<vmem>>, vector<1x4x256xf32>
    %cst = arith.constant dense<0.000000e+00> : vector<1x4xf32>
    %1 = vector.multi_reduction <add>, %0, %cst [2] : vector<1x4x256xf32> to vector<1x4xf32>
    %cst_2 = arith.constant 3.906250e-03 : f32
    %2 = vector.broadcast %cst_2 : f32 to vector<1x4xf32>
    %3 = arith.mulf %1, %2 : vector<1x4xf32>
    %c0_3 = arith.constant 0 : index
    %c0_4 = arith.constant 0 : index
    %4 = vector.load %arg2[%c0_3, %c0_4] : memref<4x2xf32, #tpu.memory_space<vmem>>, vector<4x2xf32>
    %cst_5 = arith.constant dense<0.000000e+00> : vector<1x2xf32>
    %5 = tpu.matmul %3, %4, %cst_5 {dimension_numbers = #tpu.dot_dimension_numbers<[1], [0], [0], [1], [0, 0, 1, 1], [], []>} : vector<1x4xf32>, vector<4x2xf32>, vector<1x2xf32> -> vector<1x2xf32>
    %c0_6 = arith.constant 0 : index
    %c0_7 = arith.constant 0 : index
    %6 = vector.load %arg3[%c0_6, %c0_7] : memref<1x2xf32, #tpu.memory_space<vmem>>, vector<1x2xf32>
    %7 = arith.addf %5, %6 : vector<1x2xf32>
    %cst_8 = arith.constant 0.000000e+00 : f32
    %8 = vector.broadcast %cst_8 : f32 to vector<1x2xf32>
    %9 = arith.maximumf %7, %8 : vector<1x2xf32>
    %c0_9 = arith.constant 0 : index
    %c0_10 = arith.constant 0 : index
    %10 = vector.load %arg4[%c0_9, %c0_10] : memref<2x4xf32, #tpu.memory_space<vmem>>, vector<2x4xf32>
    %cst_11 = arith.constant dense<0.000000e+00> : vector<1x4xf32>
    %11 = tpu.matmul %9, %10, %cst_11 {dimension_numbers = #tpu.dot_dimension_numbers<[1], [0], [0], [1], [0, 0, 1, 1], [], []>} : vector<1x2xf32>, vector<2x4xf32>, vector<1x4xf32> -> vector<1x4xf32>
    %c0_12 = arith.constant 0 : index
    %c0_13 = arith.constant 0 : index
    %12 = vector.load %arg5[%c0_12, %c0_13] : memref<1x4xf32, #tpu.memory_space<vmem>>, vector<1x4xf32>
    %13 = arith.addf %11, %12 : vector<1x4xf32>
    %14 = arith.negf %13 : vector<1x4xf32>
    %15 = math.exp %14 : vector<1x4xf32>
    %cst_14 = arith.constant 1.000000e+00 : f32
    %16 = vector.broadcast %cst_14 : f32 to vector<1x4xf32>
    %17 = arith.addf %16, %15 : vector<1x4xf32>
    %18 = arith.divf %16, %17 : vector<1x4xf32>
    %19 = vector.shape_cast %18 : vector<1x4xf32> to vector<1x4x1xf32>
    %20 = vector.broadcast %19 : vector<1x4x1xf32> to vector<1x4x256xf32>
    %21 = arith.mulf %0, %20 : vector<1x4x256xf32>
    %c0_15 = arith.constant 0 : index
    %c0_16 = arith.constant 0 : index
    %c0_17 = arith.constant 0 : index
    %22 = vector.load %arg6[%c0_15, %c0_16, %c0_17] : memref<1x4x256xf32, #tpu.memory_space<vmem>>, vector<1x4x256xf32>
    tpu.vector_store %arg6[%c0_15, %c0_16, %c0_17], %21 {strides = array<i32>} : memref<1x4x256xf32, #tpu.memory_space<vmem>>, vector<1x4x256xf32>,
    return
  }
  func.func @transform_0(%arg0: i32) -> (i32, i32, i32) {
    %c0_i32 = arith.constant 0 : i32
    %c0_i32_0 = arith.constant 0 : i32
    %c0_i32_1 = arith.constant 0 : i32
    return %arg0, %c0_i32, %c0_i32_0 : i32, i32, i32
  }
  func.func @transform_1(%arg0: i32) -> (i32, i32) {
    %c0_i32 = arith.constant 0 : i32
    %c0_i32_0 = arith.constant 0 : i32
    %c0_i32_1 = arith.constant 0 : i32
    return %c0_i32, %c0_i32_0 : i32, i32
  }
  func.func @transform_2(%arg0: i32) -> (i32, i32) {
    %c0_i32 = arith.constant 0 : i32
    %c0_i32_0 = arith.constant 0 : i32
    %c0_i32_1 = arith.constant 0 : i32
    return %c0_i32, %c0_i32_0 : i32, i32
  }
  func.func @transform_3(%arg0: i32) -> (i32, i32) {
    %c0_i32 = arith.constant 0 : i32
    %c0_i32_0 = arith.constant 0 : i32
    %c0_i32_1 = arith.constant 0 : i32
    return %c0_i32, %c0_i32_0 : i32, i32
  }
  func.func @transform_4(%arg0: i32) -> (i32, i32) {
    %c0_i32 = arith.constant 0 : i32
    %c0_i32_0 = arith.constant 0 : i32
    %c0_i32_1 = arith.constant 0 : i32
    return %c0_i32, %c0_i32_0 : i32, i32
  }
  func.func @transform_5(%arg0: i32) -> (i32, i32, i32) {
    %c0_i32 = arith.constant 0 : i32
    %c0_i32_0 = arith.constant 0 : i32
    %c0_i32_1 = arith.constant 0 : i32
    return %arg0, %c0_i32, %c0_i32_0 : i32, i32, i32
  }
}

</mosaic_0001>

<bundles_post_ra>
// kernel: tpu_custom_call.1
= control target key start
LH: loop header
LB: loop body
LE: loop exit
PB: predicated region body
PF: predicated region fallthrough
CT: control target
= control target key end

     0   :  { %10 = vsyncpa [#allocation3], 0  ;;  %s790_s0 = inlined_call_operand.hbm [shape: f32[2,4,256], index: 0, kind: input, shape index: {}]   ;;  %s791_s1 = inlined_call_operand.vmem [shape: f32[4,2], index: 1, kind: input, shape index: {}]   ;;  %s792_s2 = inlined_call_operand.vmem [shape: f32[1,2], index: 2, kind: input, shape index: {}]   ;;  %s793_s3 = inlined_call_operand.vmem [shape: f32[2,4], index: 3, kind: input, shape index: {}]   ;;  %s794_s4 = inlined_call_operand.vmem [shape: f32[1,4], index: 4, kind: input, shape index: {}]   ;;  %s795_s5 = inlined_call_operand.hbm [shape: f32[2,4,256], index: 5, kind: output, shape index: {}]  }
   0x1   :  { %12 = vsyncpa [#allocation3 + $0x1], 0 }
   0x2   :  { %13 = vsyncpa [#allocation4], 0 }
   0x3   :  { %15 = vsyncpa [#allocation4 + $0x1], 0  ;;  %s643_s18 = smov 0   ;;  %s645_s19 = smov 0  }
   0x4   :  { %s647_s20 = smov 0   ;;  %s649_s21 = smov 0  }
   0x5 LB: > { %s664_s22 = sadd.s32 4294967295, %s610_s21   ;;  %s441_s23 = sadd.s32 4294967294, %s610_s21   ;;  %s610_s21 = sphi %s649_s21, %s805_s21   ;;  %s606_s20 = sphi %s647_s20, %s804_s20   ;;  %s602_s19 = sphi %s645_s19, %s803_s19   ;;  %s598_s18 = sphi %s643_s18, %s802_s18  }
   0x6   : > { %s668_s24 = sadd.s32 1, %s610_s21   ;;  %s28_s25 = sadd.s32 1, %s606_s20 }
   0x7   : > { %s25_s26 = ssub.s32 %s610_s21, %s668_s24  ;;  %p35_p0 = scmp.ne.s32.totalorder %s606_s20, %s602_s19 }
   0x8   : > { %p26_p1 = scmp.eq.s32.totalorder %s25_s26, 0  ;;  %p36_p2 = scmp.eq.s32.totalorder %s610_s21, 0 }
   0x9   : > { %p41_p3 = scmp.ne.s32.totalorder %s602_s19, %s598_s18  ;;  %p42_p4 = scmp.eq.s32.totalorder %s664_s22, 0 }
   0xa   : > { %s680_s27 = scalar_select %p26_p1, %s606_s20, %s28_s25  }
   0xb   : > { %p682_p5 = por %p36_p2, %p35_p0  ;;  %p686_p6 = por %p42_p4, %p41_p3 }
   0xc   : > { %p149_p7 = scmp.eq.s32.totalorder %s664_s22, 1  ;;  %p155_p8 = scmp.eq.s32.totalorder %s441_s23, 1 }
   0xd   : > { %p474_p10 = scmp.lt.s32.totalorder %s610_s21, 2  ;;  %s187_s7 = sand.u32 1, %s606_s20  }
   0xe   : > { %p693_p11 = por %p149_p7, %p35_p0  ;;  %p697_p12 = por %p155_p8, %p41_p3 }
   0xf   : > { %s460_s8 = sshll.u32 %s610_s21, 3  ;;  %s444_s9 = sshll.u32 %s187_s7, 3 }
  0x10   : > { %s196_s12 = scalar_lea.hbm %s790_s0, %s460_s8  ;;  %s191_s14 = scalar_lea.vmem [#allocation2], %s444_s9 }
  0x11   : > { %s198_s13 = sshll.u32 %s196_s12, 4  ;;  %s200_s15 = sshll.u32 %s191_s14, 4  ;;  %s199_s13 = int_to_ptr.hbm [resolvable:$true] %s198_s13  ;;  %s201_s15 = int_to_ptr.vmem [resolvable:$true] %s200_s15 }
  0x12   : > { %p708_p13 = pnand %p474_p10, %p682_p5  ;;  %p447_p0 = scmp.ge.s32.totalorder %s610_s21, 1 }
  0x13   : > { %p205_p1 = scmp.lt.s32.totalorder %s610_s21, 3  ;;  %s188_s17 = scalar_lea.sflag [#allocation3], %s187_s7 }
  0x14   : > { %s514_s23 = sshra.s32 %s199_s13, 4  ;;  %p518_p3 = pneg %p708_p13  ;;  %s515_s23 = int_to_ptr.hbm [resolvable:$true] %s514_s23 }
  0x15   : > { %s516_s25 = scalar_lea.hbm %s515_s23, 8  ;;  %s521_s28 = scalar_lea.hbm %s790_s0, 16 }
  0x16   : > { %p517_p2 = scmp.ne.s32.totalorder %s515_s23, %s516_s25  ;;  %p522_p5 = scmp.lt.s32.totalorder %s515_s23, %s790_s0 }
  0x17   : > { %p523_p8 = scmp.lt.s32.totalorder %s521_s28, %s516_s25 }
  0x18   : > { %p519_p4 = pnand %p518_p3, %p517_p2 }
  0x19   : > { %p524_p10 = por %p523_p8, %p522_p5 }
  0x1a   : > { %p520_p7 = pneg %p519_p4 }
  0x1c   : > { %p525_p9 = pnand %p524_p10, %p520_p7 }
  0x1e   : > { %528 = shalt.err (!%p525_p9)
}
  0x1f   : > { %469 = dma.hbm_to_vmem [thread:$0]  (!%p708_p13), %s199_s13, 128, %s201_s15, %s188_s17  }
  0x20   : > { %p206_p2 = pnand %p447_p0, %p205_p1 }
  0x21   : > { %s729_s7 = sand.u32 (!%p206_p2), 1, %s602_s19  }
  0x22   : > { %209 = sbr.rel (%p206_p2) target bundleno = 582 (0x246), region = 40  ;;  %s448_s11 = sshll.u32 (!%p206_p2), %s729_s7, 3 }
  0x23   : > { %s212_s12 = scalar_lea.sflag (!%p206_p2), [#allocation3], %s729_s7  ;;  %s215_s14 = scalar_lea.vmem (!%p206_p2), [#allocation2], %s448_s11 }
  0x27   : > { %589 = dma.done.wait (%p686_p6), %s212_s12, 128  }
  0x28   : > { %591 = vsyncadd (%p686_p6), %s212_s12, 4294967168  ;;  %v739_v0 = vld [vmem:[%s215_s14] sm:$0xff]  ;;  %vm250_vm0 = vcmask 1043456   ;;  %v257_v6 = vld [vmem:[%s791_s1] sm:$0xf]  ;;  %v260_v7 = vlaneseq  ;;  %vm263_vm1 = vcmask 31744  }
  0x29   : > { %245 = vst [vmem:[#allocation1] ss:$2 sm:$0xff] %v739_v0  ;;  %450 = vmatpush.msk.msra.mxu0 %vm250_vm0, %v257_v6  ;;  %v290_v12 = vld [vmem:[%s793_s3] sm:$0x3]  ;;  %vm296_vm2 = vcmask 1041408   ;;  %vm292_vm3 = vcmask 15360  }
  0x2a   : > { %v261_v8 = vand.u32 127, %v260_v7  ;;  %452 = vmatpush.msk.msra.mxu1 %vm296_vm2, %v290_v12  ;;  %v258_v13 = vld [vmem:[%s792_s2] sm:$0x1]  ;;  %v341_v17 = vshrl.u32 %v260_v7, 7  ;;  %v612_v35 = vmov 839922192  }
  0x2b   : > { %v291_v18 = vld [vmem:[%s794_s4] sm:$0x1]  ;;  %v348_v36 = vunpack.c.l.s4 %v612_v35  ;;  %s461_s8 = sshll.u32 %s664_s22, 3  ;;  %s242_s12 = scalar_lea.vmem [#allocation5], %s448_s11 }
  0x2c   : > { %509 = vset.pattern.permute.xlu0 %v341_v17  ;;  %s366_s10 = scalar_lea.hbm %s795_s5, %s461_s8  ;;  %s368_s14 = sshll.u32 %s242_s12, 4  ;;  %s369_s14 = int_to_ptr.vmem [resolvable:$true] %s368_s14 }
  0x2d   : > { %v349_v37 = vunpack.c.0.s8 %v348_v36  ;;  %s370_s13 = sshll.u32 %s366_s10, 4  ;;  %s355_s15 = scalar_lea.sflag [#allocation4], %s729_s7  ;;  %s371_s13 = int_to_ptr.hbm [resolvable:$true] %s370_s13 }
  0x2e   : > { %s558_s29 = sshra.s32 %s371_s13, 4  ;;  %s564_s11 = scalar_lea.hbm %s795_s5, 16  ;;  %s559_s29 = int_to_ptr.hbm [resolvable:$true] %s558_s29 }
  0x2f   : > { %s560_s22 = scalar_lea.hbm %s559_s29, 8  ;;  %p565_p0 = scmp.lt.s32.totalorder %s559_s29, %s795_s5 }
  0x30   : > { %v246_v1 = vld.sshfl [vmem:[#allocation1] sm:$0xff pattern:$0x75316420]  ;;  %v247_v2 = vld.sshfl [vmem:[#allocation1 + $0x8] sm:$0xff pattern:$0x75316420]  ;;  %p561_p6 = scmp.ne.s32.totalorder %s559_s29, %s560_s22  ;;  %p566_p1 = scmp.lt.s32.totalorder %s564_s11, %s560_s22 }
  0x31   : > { %v251_v3 = vsel %vm250_vm0, %v246_v1, 0.0  ;;  %v252_v4 = vsel %vm250_vm0, %v247_v2, 0.0 }
  0x32   : > { %v253_v5 = vadd.f32 %v252_v4, %v251_v3  ;;  %p562_p9 = pnand %p561_p6, %p693_p11  ;;  %p567_p3 = por %p566_p1, %p565_p0 }
  0x34   : > { %254 = vadd.xlane.f32.xlu0 %v253_v5  ;;  %p563_p13 = pneg %p562_p9 }
  0x36   : > { %p568_p4 = pnand %p567_p3, %p563_p13 }
  0xa7   : > { %v255_v9 = vpop.xlane.xlu0 %254 }
  0xa8   : > { %v256_v10 = vmul.f32 0.00390625, %v255_v9 }
  0xaa   : > { %v262_v11 = vperm.slane %v256_v10, %v261_v8 }
  0xac   : > { %451 = vmatmul.msk.f32.vlgmr.msra.gmra.mxu0 %vm263_vm1, %v262_v11 }
 0x129   : > { %v286_v14 = vpop.f32.mrf.mxu0 }
 0x12a   : > { %v287_v15 = vadd.f32 %v286_v14, %v258_v13 }
 0x12c   : > { %v289_v16 = vmax.f32 %v287_v15, 0.0 }
 0x12e   : > { %453 = vmatmul.msk.f32.vlgmr.msra.gmra.mxu1 %vm292_vm3, %v289_v16 }
 0x1ab   : > { %v317_v19 = vpop.f32.mrf.mxu1 }
 0x1ac   : > { %v318_v20 = vadd.f32 %v317_v19, %v291_v18 }
 0x1ae   : > { %v454_v21 = vmul.f32 -1.442695, %v318_v20 }
 0x1b0   : > { %510 = vpow2.f32 %v454_v21 }
 0x1b6   : > { %v511_v22 = vpop.eup %510 }
 0x1b7   : > { %v323_v23 = vadd.f32 1.0, %v511_v22 }
 0x1b9   : > { %512 = vrcp.f32 %v323_v23  ;;  %v335_v27 = vand.u32 2147483648, %v323_v23  ;;  %v333_v29 = vand.u32 2147483647, %v323_v23  ;;  %vm329_vm5 = vweird.f32 %v323_v23 }
 0x1bb   : > { %v336_v31 = vor.u32 1.1754944e-38, %v335_v27  ;;  %vm334_vm7 = vcmp.eq.f32.partialorder %v333_v29, 8.507059e+37 }
 0x1bf   : > { %v513_v24 = vpop.eup %512 }
 0x1c0   : > { %v325_v25 = vmul.f32 %v513_v24, %v323_v23  ;;  %vm330_vm4 = vweird.f32 %v513_v24 }
 0x1c1   : > { %vm331_vm6 = vmor %vm329_vm5, %vm330_vm4 }
 0x1c2   : > { %v326_v26 = vsub.f32 1.0, %v325_v25 }
 0x1c4   : > { %v327_v28 = vmul.f32 %v513_v24, %v326_v26 }
 0x1c6   : > { %v328_v30 = vadd.f32 %v513_v24, %v327_v28 }
 0x1c8   : > { %v332_v32 = vsel %vm331_vm6, %v513_v24, %v328_v30 }
 0x1c9   : > { %v337_v33 = vsel %vm334_vm7, %v336_v31, %v332_v32 }
 0x1ca   : > { %v339_v34 = vperm.slane %v337_v33, 0 }
 0x1cc   : > { %344 = vperm.xlu0 %509, %v339_v34  }
 0x23e   : > { %v345_v38 = vpop.permute.xlu0 %344 }
 0x23f   : > { %v350_v39 = vperm.slane %v345_v38, %v349_v37 }
 0x241   : > { %v352_v40 = vmul.f32 %v350_v39, %v739_v0 }
 0x243   : > { %353 = vst [vmem:[%s242_s12] sm:$0xff] %v352_v40 }
 0x244   : > { %571 = shalt.err (!%p568_p4)
}
 0x245   : > { %464 = dma.vmem_to_hbm [thread:$0]  (%p693_p11), %s369_s14, 128, %s371_s13, %s355_s15  }
 0x246 PF: > { %s382_s7 = sand.u32 1, %s598_s18   ;;  %p801_p7 = scmp.ge.s32.totalorder %s610_s21, 2 }
 0x247   : > { %s383_s26 = scalar_lea.sflag [#allocation4], %s382_s7 }
 0x248   : > { %p471_p5 = pnand %p801_p7, %p697_p12 }
 0x24a   : > { %p472_p8 = pneg %p471_p5 }
 0x24c   : > { %593 = dma.done.wait (%p472_p8), %s383_s26, 128  }
 0x24d   : > { %595 = vsyncadd (%p472_p8), %s383_s26, 4294967168  ;;  %p18_p10 = scmp.ge.s32.totalorder %s668_s24, 4   ;;  %s802_s18 = smov %s602_s19 }
 0x24e   : > { %s803_s19 = smov %s606_s20  ;;  %s804_s20 = smov %s680_s27 }
 0x24f   : > { %s805_s21 = smov %s668_s24  ;;  %20 = sbr.rel (!%p18_p10) target bundleno = 5 (0x5), region = 85 }
 0x254   :  { %389 = vsyncpa [#allocation3], 1 }
 0x255   :  { %391 = vsyncpa [#allocation3 + $0x1], 1 }
 0x256   :  { %392 = vsyncpa [#allocation4], 1 }
 0x257   :  { %394 = vsyncpa [#allocation4 + $0x1], 1 }

</bundles_post_ra>
